<compile_context>
chip_gen: v7x
topology: tpu7x:2x2x1
jax: 0.10.0
libtpu: 0.0.40
codegen_flags: <defaults>
</compile_context>

<pallas_src>
import functools

import jax
import jax.numpy as jnp
from jax.experimental import pallas as pl
from jax.experimental.pallas import tpu as pltpu

_LANES = 128
_SUB = 16  # sublane granule (covers f32 (8) and bf16 (16) packing)


def _deconv_mlp_kernel(x_ref, w1_ref, b1_ref, w2_ref, b2_ref, o_ref):
    # x_ref : (tb, F)    f32        w1_ref: (F, H)      mm dtype
    # b1_ref: (1, H)     f32        w2_ref: (H, O_pad)  mm dtype
    # b2_ref: (1, O_pad) f32        o_ref : (tb, O)     f32
    # Cast activations to the MXU dtype on the VPU (free under the input DMA).
    x = x_ref[...].astype(w1_ref.dtype)

    # Linear 1 (MXU, f32 accumulation) + bias + ReLU (VPU).
    h = jnp.dot(x, w1_ref[...], preferred_element_type=jnp.float32) + b1_ref[...]
    h = jnp.maximum(h, 0.0)

    # Linear 2: lane-padded logits (pad columns carry a -1e30 bias).
    logits = (
        jnp.dot(h.astype(w2_ref.dtype), w2_ref[...],
                preferred_element_type=jnp.float32)
        + b2_ref[...]
    )

    # Numerically stable softmax over the lane-dense padded axis; padded
    # columns contribute exp(-huge) == 0 to both max and sum.
    m = jnp.max(logits, axis=-1, keepdims=True)
    e = jnp.exp(logits - m)
    denom = jnp.sum(e, axis=-1, keepdims=True)
    # EUP approximate reciprocal + one Newton-Raphson refinement step.
    r = pl.reciprocal(denom, approx=True)
    r = r * (2.0 - denom * r)
    probs = e * r

    # Store only the real output columns (block spans full rows of the HBM
    # output array, so the writeback DMA stays contiguous).
    o_ref[...] = probs[:, : o_ref.shape[-1]].astype(o_ref.dtype)


@functools.partial(jax.jit, static_argnames=("block_b", "use_bf16"))
def deconvolution_layer(x, w1, b1, w2, b2, *, block_b=4096, use_bf16=True):
    """Pallas TPU implementation of DeconvolutionLayer.forward.

    x : (B, input_dim + cell_type_dim) float32
    w1: (input_dim + cell_type_dim, 128)   b1: (1, 128)
    w2: (128, output_dim)                  b2: (1, output_dim)
    returns (B, output_dim) float32, rows sum to 1.
    """
    B, F = x.shape
    H = w1.shape[1]
    O = w2.shape[1]

    # ---- lane-dense compute: pad the softmax axis of the (tiny) weights ----
    O_pad = max(_LANES, pl.cdiv(O, _LANES) * _LANES)
    if O_pad != O:
        w2 = jnp.pad(w2, ((0, 0), (0, O_pad - O)))
        # Huge negative bias on pad columns -> softmax contribution is 0.
        b2 = jnp.pad(b2, ((0, 0), (0, O_pad - O)), constant_values=-1e30)

    # ---- batch tiling: big sublane-aligned tiles, no wrapper-side padding ----
    # Guarantee >= 2 grid steps whenever B allows it (v7x megacore sharding),
    # while capping the tile at block_b.
    half = pl.cdiv(pl.cdiv(B, 2), _SUB) * _SUB
    tb = max(_SUB, min(block_b, half))
    num_blocks = pl.cdiv(B, tb)          # trailing ragged block handled by Pallas
    grid = (num_blocks,)

    # ---- dtypes: bf16 weights for the MXU; x stays f32 (cast in-kernel) ----
    mm_dtype = jnp.bfloat16 if use_bf16 else jnp.float32
    mm_bytes = jnp.dtype(mm_dtype).itemsize
    w1_mm = w1.astype(mm_dtype)
    w2_mm = w2.astype(mm_dtype)
    b1_f = b1.astype(jnp.float32)
    b2_f = b2.astype(jnp.float32)
    x_f = x.astype(jnp.float32)

    # VMEM budget: double-buffered x / out tiles, resident weights, and the
    # per-tile activation scratch (h, bf16 copy of h, logits/exp temporaries).
    vmem_est = (
        2 * tb * F * 4                                   # x tiles
        + 2 * tb * O * 4                                 # output tiles
        + 2 * ((F * H + H * O_pad) * mm_bytes + (H + O_pad) * 4)  # weights
        + tb * H * (4 + mm_bytes)                        # hidden activations
        + 3 * tb * O_pad * 4                             # softmax temporaries
    )
    vmem_limit = int(min(max(int(1.5 * vmem_est), 8 << 20), 48 << 20))

    cost = pl.CostEstimate(
        flops=2 * B * (F * H + H * O_pad),
        transcendentals=B * O_pad,
        bytes_accessed=(
            B * F * 4                                    # x (f32, read once)
            + (F * H + H * O_pad) * mm_bytes             # weights
            + (H + O_pad) * 4                            # biases
            + B * O * 4                                  # un-padded output
        ),
    )

    return pl.pallas_call(
        _deconv_mlp_kernel,
        out_shape=jax.ShapeDtypeStruct((B, O), jnp.float32),
        grid_spec=pltpu.PrefetchScalarGridSpec(
            num_scalar_prefetch=0,
            grid=grid,
            in_specs=[
                pl.BlockSpec((tb, F), lambda i: (i, 0)),      # x tile over batch
                pl.BlockSpec((F, H), lambda i: (0, 0)),       # W1 (resident)
                pl.BlockSpec((1, H), lambda i: (0, 0)),       # b1
                pl.BlockSpec((H, O_pad), lambda i: (0, 0)),   # W2 (lane-padded)
                pl.BlockSpec((1, O_pad), lambda i: (0, 0)),   # b2 (lane-padded)
            ],
            out_specs=pl.BlockSpec((tb, O), lambda i: (i, 0)),  # un-padded output
        ),
        compiler_params=pltpu.CompilerParams(
            dimension_semantics=("parallel",),  # megacore-shardable batch axis
            vmem_limit_bytes=vmem_limit,
        ),
        cost_estimate=cost,
    )(x_f, w1_mm, b1_f, w2_mm, b2_f)


def _reference(x, w1, b1, w2, b2):
    h = jnp.maximum(jnp.dot(x, w1, precision="highest") + b1, 0.0)
    logits = jnp.dot(h, w2, precision="highest") + b2
    return jax.nn.softmax(logits, axis=-1)


if __name__ == "__main__":
    # Small, module-consistent shapes.
    input_dim = 24
    cell_type_dim = 8
    output_dim = 16
    hidden = 128
    batch = 37                        # not tile-aligned (tests ragged last block)
    F_in = input_dim + cell_type_dim  # 32

    key = jax.random.PRNGKey(0)
    kx, k1, k2, k3, k4 = jax.random.split(key, 5)

    # Deterministic synthetic parameters (not a checkpoint load).
    x = jax.random.normal(kx, (batch, F_in), dtype=jnp.float32)
    w1 = jax.random.normal(k1, (F_in, hidden), dtype=jnp.float32) * 0.1
    b1 = jax.random.normal(k2, (1, hidden), dtype=jnp.float32) * 0.1
    w2 = jax.random.normal(k3, (hidden, output_dim), dtype=jnp.float32) * 0.1
    b2 = jax.random.normal(k4, (1, output_dim), dtype=jnp.float32) * 0.1

    ref = _reference(x, w1, b1, w2, b2)

    # f32 MXU path: tight check of the fused kernel math.
    out_f32 = jax.block_until_ready(
        deconvolution_layer(x, w1, b1, w2, b2, use_bf16=False))
    assert out_f32.shape == (batch, output_dim)
    assert jnp.allclose(out_f32, ref, atol=1e-4, rtol=1e-4), "f32 mismatch vs ref"
    assert jnp.allclose(jnp.sum(out_f32, axis=-1), 1.0, atol=1e-4), "rows != 1"

    # bf16 MXU fast path (default): looser tolerance due to bf16 inputs.
    out = jax.block_until_ready(deconvolution_layer(x, w1, b1, w2, b2))
    assert out.shape == (batch, output_dim)
    assert jnp.allclose(out, ref, atol=5e-3), "bf16 mismatch vs reference"
    assert jnp.allclose(jnp.sum(out, axis=-1), 1.0, atol=1e-4), "rows must sum to 1"

    print("KERNEL_OK")
</pallas_src>

<mosaic_0001>
module attributes {stable_mosaic.version = 11 : i64} {
  func.func @_deconv_mlp_kernel(%arg0: i32, %arg1: memref<32x32xf32, #tpu.memory_space<vmem>>, %arg2: memref<32x128xf32, #tpu.memory_space<vmem>>, %arg3: memref<1x128xf32, #tpu.memory_space<vmem>>, %arg4: memref<128x128xf32, #tpu.memory_space<vmem>>, %arg5: memref<1x128xf32, #tpu.memory_space<vmem>>, %arg6: memref<32x16xf32, #tpu.memory_space<vmem>>) attributes {dimension_semantics = [#tpu.dimension_semantics<parallel>], iteration_bounds = array<i64: 2>, scalar_prefetch = 0 : i64, scratch_operands = 0 : i64, tpu.core_type = #tpu.core_type<tc>, window_params = [{transform_indices = @transform_0, window_bounds = array<i64: 32, 32>}, {pipeline_mode = #tpu.pipeline_mode<synchronous>, transform_indices = @transform_1, window_bounds = array<i64: 32, 128>}, {pipeline_mode = #tpu.pipeline_mode<synchronous>, transform_indices = @transform_2, window_bounds = array<i64: 1, 128>}, {pipeline_mode = #tpu.pipeline_mode<synchronous>, transform_indices = @transform_3, window_bounds = array<i64: 128, 128>}, {pipeline_mode = #tpu.pipeline_mode<synchronous>, transform_indices = @transform_4, window_bounds = array<i64: 1, 128>}, {transform_indices = @transform_5, window_bounds = array<i64: 32, 16>}]} {
    %c0 = arith.constant 0 : index
    %c0_0 = arith.constant 0 : index
    %0 = vector.load %arg1[%c0, %c0_0] : memref<32x32xf32, #tpu.memory_space<vmem>>, vector<32x32xf32>
    %c0_1 = arith.constant 0 : index
    %c0_2 = arith.constant 0 : index
    %1 = vector.load %arg2[%c0_1, %c0_2] : memref<32x128xf32, #tpu.memory_space<vmem>>, vector<32x128xf32>
    %cst = arith.constant dense<0.000000e+00> : vector<32x128xf32>
    %2 = tpu.matmul %0, %1, %cst {dimension_numbers = #tpu.dot_dimension_numbers<[1], [0], [0], [1], [0, 0, 1, 1], [], []>} : vector<32x32xf32>, vector<32x128xf32>, vector<32x128xf32> -> vector<32x128xf32>
    %c0_3 = arith.constant 0 : index
    %c0_4 = arith.constant 0 : index
    %3 = vector.load %arg3[%c0_3, %c0_4] : memref<1x128xf32, #tpu.memory_space<vmem>>, vector<1x128xf32>
    %4 = vector.broadcast %3 : vector<1x128xf32> to vector<32x128xf32>
    %5 = arith.addf %2, %4 : vector<32x128xf32>
    %cst_5 = arith.constant 0.000000e+00 : f32
    %6 = vector.broadcast %cst_5 : f32 to vector<32x128xf32>
    %7 = arith.maximumf %5, %6 : vector<32x128xf32>
    %c0_6 = arith.constant 0 : index
    %c0_7 = arith.constant 0 : index
    %8 = vector.load %arg4[%c0_6, %c0_7] : memref<128x128xf32, #tpu.memory_space<vmem>>, vector<128x128xf32>
    %cst_8 = arith.constant dense<0.000000e+00> : vector<32x128xf32>
    %9 = tpu.matmul %7, %8, %cst_8 {dimension_numbers = #tpu.dot_dimension_numbers<[1], [0], [0], [1], [0, 0, 1, 1], [], []>} : vector<32x128xf32>, vector<128x128xf32>, vector<32x128xf32> -> vector<32x128xf32>
    %c0_9 = arith.constant 0 : index
    %c0_10 = arith.constant 0 : index
    %10 = vector.load %arg5[%c0_9, %c0_10] : memref<1x128xf32, #tpu.memory_space<vmem>>, vector<1x128xf32>
    %11 = vector.broadcast %10 : vector<1x128xf32> to vector<32x128xf32>
    %12 = arith.addf %9, %11 : vector<32x128xf32>
    %cst_11 = arith.constant dense<0xFF800000> : vector<32xf32>
    %13 = vector.multi_reduction <maximumf>, %12, %cst_11 [1] : vector<32x128xf32> to vector<32xf32>
    %14 = vector.shape_cast %13 : vector<32xf32> to vector<32x1xf32>
    %15 = vector.broadcast %14 : vector<32x1xf32> to vector<32x128xf32>
    %16 = arith.subf %12, %15 : vector<32x128xf32>
    %17 = math.exp %16 : vector<32x128xf32>
    %cst_12 = arith.constant dense<0.000000e+00> : vector<32xf32>
    %18 = vector.multi_reduction <add>, %17, %cst_12 [1] : vector<32x128xf32> to vector<32xf32>
    %19 = vector.shape_cast %18 : vector<32xf32> to vector<32x1xf32>
    %20 = tpu.reciprocal %19 {approx = true} : vector<32x1xf32> -> vector<32x1xf32>
    %21 = arith.mulf %19, %20 : vector<32x1xf32>
    %cst_13 = arith.constant 2.000000e+00 : f32
    %22 = vector.broadcast %cst_13 : f32 to vector<32x1xf32>
    %23 = arith.subf %22, %21 : vector<32x1xf32>
    %24 = arith.mulf %20, %23 : vector<32x1xf32>
    %25 = vector.broadcast %24 : vector<32x1xf32> to vector<32x128xf32>
    %26 = arith.mulf %17, %25 : vector<32x128xf32>
    %27 = vector.extract_strided_slice %26 {offsets = [0, 0], sizes = [32, 16], strides = [1, 1]} : vector<32x128xf32> to vector<32x16xf32>
    %c0_14 = arith.constant 0 : index
    %c0_15 = arith.constant 0 : index
    %28 = vector.load %arg6[%c0_14, %c0_15] : memref<32x16xf32, #tpu.memory_space<vmem>>, vector<32x16xf32>
    tpu.vector_store %arg6[%c0_14, %c0_15], %27 {strides = array<i32>} : memref<32x16xf32, #tpu.memory_space<vmem>>, vector<32x16xf32>,
    return
  }
  func.func @transform_0(%arg0: i32) -> (i32, i32) {
    %c0_i32 = arith.constant 0 : i32
    %c0_i32_0 = arith.constant 0 : i32
    return %arg0, %c0_i32 : i32, i32
  }
  func.func @transform_1(%arg0: i32) -> (i32, i32) {
    %c0_i32 = arith.constant 0 : i32
    %c0_i32_0 = arith.constant 0 : i32
    %c0_i32_1 = arith.constant 0 : i32
    return %c0_i32, %c0_i32_0 : i32, i32
  }
  func.func @transform_2(%arg0: i32) -> (i32, i32) {
    %c0_i32 = arith.constant 0 : i32
    %c0_i32_0 = arith.constant 0 : i32
    %c0_i32_1 = arith.constant 0 : i32
    return %c0_i32, %c0_i32_0 : i32, i32
  }
  func.func @transform_3(%arg0: i32) -> (i32, i32) {
    %c0_i32 = arith.constant 0 : i32
    %c0_i32_0 = arith.constant 0 : i32
    %c0_i32_1 = arith.constant 0 : i32
    return %c0_i32, %c0_i32_0 : i32, i32
  }
  func.func @transform_4(%arg0: i32) -> (i32, i32) {
    %c0_i32 = arith.constant 0 : i32
    %c0_i32_0 = arith.constant 0 : i32
    %c0_i32_1 = arith.constant 0 : i32
    return %c0_i32, %c0_i32_0 : i32, i32
  }
  func.func @transform_5(%arg0: i32) -> (i32, i32) {
    %c0_i32 = arith.constant 0 : i32
    %c0_i32_0 = arith.constant 0 : i32
    return %arg0, %c0_i32 : i32, i32
  }
}

</mosaic_0001>

<bundles_post_ra>
// kernel: deconvolution_layer.1
= control target key start
LH: loop header
LB: loop body
LE: loop exit
PB: predicated region body
PF: predicated region fallthrough
CT: control target
= control target key end

     0   :  { %s1126_s18 = smov 0   ;;  %s1128_s19 = smov 0   ;;  %s1300_s0 = inlined_call_operand.vmem [shape: f32[37,32], index: 0, kind: input, shape index: {}]   ;;  %s1301_s1 = inlined_call_operand.vmem [shape: f32[32,128], index: 1, kind: input, shape index: {}]   ;;  %s1302_s2 = inlined_call_operand.vmem [shape: f32[1,128], index: 2, kind: input, shape index: {}]   ;;  %s1303_s3 = inlined_call_operand.vmem [shape: f32[128,128], index: 3, kind: input, shape index: {}]   ;;  %s1304_s4 = inlined_call_operand.vmem [shape: f32[1,128], index: 4, kind: input, shape index: {}]   ;;  %s1305_s5 = inlined_call_operand.vmem [shape: f32[37,16], index: 5, kind: output, shape index: {}]  }
   0x1   :  { %s1130_s20 = smov 0  }
   0x2 LB: > { %s1139_s21 = sadd.s32 4294967295, %s1062_s20   ;;  %s1141_s22 = sadd.s32 1, %s1062_s20   ;;  %s1062_s20 = sphi %s1130_s20, %s1312_s20   ;;  %s1058_s19 = sphi %s1128_s19, %s1311_s19   ;;  %s1054_s18 = sphi %s1126_s18, %s1310_s18  }
   0x3   : > { %s129_s23 = ssub.s32 %s1062_s20, %s1141_s22  ;;  %s132_s24 = sadd.s32 1, %s1058_s19 }
   0x4   : > { %p130_p0 = scmp.eq.s32.totalorder %s129_s23, 0  ;;  %p142_p1 = scmp.ne.s32.totalorder %s1058_s19, %s1054_s18 }
   0x5   : > { %p143_p2 = scmp.eq.s32.totalorder %s1139_s21, 1  ;;  %p754_p3 = scmp.ge.s32.totalorder %s1062_s20, 1 }
   0x6   : > { %s1149_s25 = scalar_select %p130_p0, %s1058_s19, %s132_s24  }
   0x7   : > { %p1151_p4 = por %p143_p2, %p142_p1  ;;  %p196_p5 = scmp.lt.s32.totalorder %s1062_s20, 3 }
   0x9   : > { %p197_p6 = pnand %p754_p3, %p196_p5 }
   0xa   : > { %v250_v0 = vld [vmem:[%s1301_s1] sm:$0xff] (!%p197_p6)  ;;  %v251_v1 = vld [vmem:[%s1301_s1 + $0x8] sm:$0xff] (!%p197_p6)  ;;  %v252_v2 = vld [vmem:[%s1301_s1 + $0x10] sm:$0xff] (!%p197_p6)  ;;  %s1165_s8 = sshll.u32 (!%p197_p6), %s1139_s21, 2  ;;  %vm261_vm0 = vcmask (!%p197_p6), 261120   ;;  %s224_s16 = sand.u32 (!%p197_p6), 1, %s1054_s18  }
   0xb   : > { %200 = sbr.rel (%p197_p6) target bundleno = 834 (0x342), region = 40  ;;  %v864_v3 = vpack.c.bf16 (!%p197_p6), %v251_v1, %v250_v0  ;;  %v253_v4 = vld [vmem:[%s1301_s1 + $0x18] sm:$0xff] (!%p197_p6)  ;;  %p232_p7 = scmp.lt.s32.totalorder (!%p197_p6), %s1165_s8, 4  ;;  %v363_v5 = vld [vmem:[%s1303_s3] sm:$0xff] (!%p197_p6)  ;;  %v364_v6 = vld [vmem:[%s1303_s3 + $0x8] sm:$0xff] (!%p197_p6)  ;;  %vm519_vm1 = vcmask (!%p197_p6), 130048  }
   0xc   : > { %v868_v7 = vpack.c.bf16 (!%p197_p6), %v253_v4, %v252_v2  ;;  %v872_v8 = vpack.c.bf16 (!%p197_p6), %v364_v6, %v363_v5  ;;  %v365_v9 = vld [vmem:[%s1303_s3 + $0x10] sm:$0xff] (!%p197_p6)  ;;  %v366_v10 = vld [vmem:[%s1303_s3 + $0x18] sm:$0xff] (!%p197_p6)  ;;  %v367_v12 = vld [vmem:[%s1303_s3 + $0x20] sm:$0xff] (!%p197_p6)  ;;  %s755_s17 = sshll.u32 (!%p197_p6), %s224_s16, 5 }
   0xd   : > { %865 = vmatprep.subr.bf16.mxu0 (!%p197_p6), %v864_v3  ;;  %v876_v11 = vpack.c.bf16 (!%p197_p6), %v366_v10, %v365_v9  ;;  %v368_v13 = vld [vmem:[%s1303_s3 + $0x28] sm:$0xff] (!%p197_p6)  ;;  %v369_v16 = vld [vmem:[%s1303_s3 + $0x30] sm:$0xff] (!%p197_p6)  ;;  %v370_v17 = vld [vmem:[%s1303_s3 + $0x38] sm:$0xff] (!%p197_p6)  ;;  %s1234_s20 = scalar_lea.vmem (!%p197_p6), [#allocation2], %s755_s17  }
   0xe   : > { %867 = vmatpush3.bf16.msra.mxu0 (!%p197_p6), %v864_v3  ;;  %873 = vmatprep.subr.bf16.mxu1 (!%p197_p6), %v872_v8  ;;  %v880_v14 = vpack.c.bf16 (!%p197_p6), %v368_v13, %v367_v12  ;;  %v884_v20 = vpack.c.bf16 (!%p197_p6), %v370_v17, %v369_v16  ;;  %v371_v21 = vld [vmem:[%s1303_s3 + $0x40] sm:$0xff] (!%p197_p6)  ;;  %v372_v22 = vld [vmem:[%s1303_s3 + $0x48] sm:$0xff] (!%p197_p6)  ;;  %v373_v25 = vld [vmem:[%s1303_s3 + $0x50] sm:$0xff] (!%p197_p6) }
   0xf   : > { %869 = vmatprep.subr.bf16.mxu0 (!%p197_p6), %v868_v7  ;;  %875 = vmatpush3.bf16.msra.mxu1 (!%p197_p6), %v872_v8  ;;  %v888_v24 = vpack.c.bf16 (!%p197_p6), %v372_v22, %v371_v21  ;;  %v374_v26 = vld [vmem:[%s1303_s3 + $0x58] sm:$0xff] (!%p197_p6)  ;;  %v375_v28 = vld [vmem:[%s1303_s3 + $0x60] sm:$0xff] (!%p197_p6)  ;;  %v376_v29 = vld [vmem:[%s1303_s3 + $0x68] sm:$0xff] (!%p197_p6) }
  0x10   : > { %877 = vmatprep.subr.bf16.mxu1 (!%p197_p6), %v876_v11  ;;  %v892_v27 = vpack.c.bf16 (!%p197_p6), %v374_v26, %v373_v25  ;;  %v896_v30 = vpack.c.bf16 (!%p197_p6), %v376_v29, %v375_v28  ;;  %v377_v31 = vld [vmem:[%s1303_s3 + $0x70] sm:$0xff] (!%p197_p6)  ;;  %v378_v32 = vld [vmem:[%s1303_s3 + $0x78] sm:$0xff] (!%p197_p6)  ;;  %v758_v34 = vld [vmem:[%s1302_s2] ss:$0 sm:$0xff] (!%p197_p6) }
  0x11   : > { %v900_v33 = vpack.c.bf16 (!%p197_p6), %v378_v32, %v377_v31  ;;  %v763_v47 = vld [vmem:[%s1304_s4] ss:$0 sm:$0xff] (!%p197_p6) }
  0x12   : > { %s233_s23 = scalar_select %p232_p7, %s1165_s8, 4  ;;  %871 = vmatpush3.bf16.msra.mxu0 %v868_v7 }
  0x13   : > { %879 = vmatpush3.bf16.msra.mxu1 %v876_v11  ;;  %s532_s18 = ssub.s32 (%p1151_p4), 5, %s1165_s8 }
  0x14   : > { %s757_s30 = sshll.u32 %s233_s23, 3  ;;  %881 = vmatprep.subr.bf16.mxu1 %v880_v14  ;;  %s781_s23 = sshll.u32 (%p1151_p4), %s1139_s21, 5 }
  0x15   : > { %s235_s9 = scalar_lea.vmem %s1300_s0, %s757_s30  ;;  %p533_p8 = scmp.lt.s32.totalorder (%p1151_p4), %s532_s18, 4 }
  0x16   : > { %v246_v15 = vld [vmem:[%s235_s9] sm:$0xff]  ;;  %v247_v18 = vld [vmem:[%s235_s9 + $0x8] sm:$0xff]  ;;  %v248_v19 = vld [vmem:[%s235_s9 + $0x10] sm:$0xff]  ;;  %s1251_s28 = scalar_lea.vmem (%p1151_p4), %s1305_s5, %s781_s23  }
  0x17   : > { %820 = vmatprep.mubr.msk.f32.mxu0 %vm261_vm0, %v246_v15  ;;  %v249_v23 = vld [vmem:[%s235_s9 + $0x18] sm:$0xff]  ;;  %883 = vmatpush3.bf16.msra.mxu1 %v880_v14 }
  0x18   : > { %821 = vmatmul.mubr.msk.f32.vlgmr.msra.gmra.mrb[0].mxu0 %vm261_vm0, %v247_v18  ;;  %885 = vmatprep.subr.bf16.mxu1 %v884_v20 }
  0x19   : > { %823 = vmatprep.mubr.msk.f32.mxu0 %vm261_vm0, %v248_v19 }
  0x1b   : > { %887 = vmatpush3.bf16.msra.mxu1 %v884_v20 }
  0x1c   : > { %824 = vmatmul.mubr.msk.f32.gmra.mrb[2].mxu0 %vm261_vm0, %v249_v23  ;;  %889 = vmatprep.subr.bf16.mxu1 %v888_v24 }
  0x1f   : > { %891 = vmatpush3.bf16.msra.mxu1 %v888_v24 }
  0x20   : > { %893 = vmatprep.subr.bf16.mxu1 %v892_v27 }
  0x23   : > { %895 = vmatpush3.bf16.msra.mxu1 %v892_v27 }
  0x24   : > { %897 = vmatprep.subr.bf16.mxu1 %v896_v30 }
  0x27   : > { %899 = vmatpush3.bf16.msra.mxu1 %v896_v30 }
  0x28   : > { %901 = vmatprep.subr.bf16.mxu1 %v900_v33 }
  0x2b   : > { %903 = vmatpush3.bf16.msra.mxu1 %v900_v33 }
  0xeb   : > { %v822_v35 = vpop.f32.mrb[0].mxu0 }
  0xec   : > { %v346_v36 = vadd.f32 %v822_v35, %v758_v34  ;;  %v340_v37 = vpop.f32.mrb[1].mxu0 }
  0xed   : > { %v341_v38 = vadd.f32 %v758_v34, %v340_v37 }
  0xee   : > { %v360_v41 = vmax.f32 %v346_v36, 0.0 }
  0xef   : > { %v825_v39 = vpop.f32.mrb[2].mxu0  ;;  %v359_v40 = vmax.f32 %v341_v38, 0.0 }
  0xf0   : > { %v356_v42 = vadd.f32 %v825_v39, %v758_v34  ;;  %v350_v43 = vpop.f32.mrb[3].mxu0 }
  0xf1   : > { %v351_v44 = vadd.f32 %v758_v34, %v350_v43  ;;  %858 = vmatprep.mubr.f32.mxu1 %v359_v40 }
  0xf2   : > { %859 = vmatmul.mubr.f32.vlgmr.msra.gmra.mrb[0].mxu1 %v360_v41  ;;  %v362_v46 = vmax.f32 %v356_v42, 0.0 }
  0xf3   : > { %v361_v45 = vmax.f32 %v351_v44, 0.0 }
  0xf5   : > { %861 = vmatprep.mubr.f32.mxu1 %v361_v45 }
  0xf6   : > { %862 = vmatmul.mubr.f32.gmra.mrb[2].mxu1 %v362_v46 }
 0x1c5   : > { %v860_v48 = vpop.f32.mrb[0].mxu1 }
 0x1c6   : > { %v452_v49 = vpop.f32.mrb[1].mxu1  ;;  %v458_v53 = vadd.f32 %v860_v48, %v763_v47 }
 0x1c7   : > { %v453_v50 = vadd.f32 %v763_v47, %v452_v49 }
 0x1c9   : > { %v863_v51 = vpop.f32.mrb[2].mxu1  ;;  %471 = vmax.xlane.f32.xlu0 %v453_v50 }
 0x1ca   : > { %v462_v52 = vpop.f32.mrb[3].mxu1  ;;  %v468_v55 = vadd.f32 %v863_v51, %v763_v47 }
 0x1cb   : > { %v463_v54 = vadd.f32 %v763_v47, %v462_v52 }
 0x1cd   : > { %475 = vmax.xlane.f32.xlu1 %v463_v54  ;;  %473 = vmax.xlane.f32.xlu0 %v458_v53 }
 0x1d1   : > { %477 = vmax.xlane.f32.xlu1 %v468_v55 }
 0x256   : > { %v472_v56 = vpop.xlane.xlu0 %471 }
 0x257   : > { %v479_v57 = vsub.f32 %v453_v50, %v472_v56 }
 0x259   : > { %v483_v58 = vmul.f32 1.442695, %v479_v57 }
 0x25a   : > { %v476_v59 = vpop.xlane.xlu1 %475  ;;  %v474_v60 = vpop.xlane.xlu0 %473 }
 0x25b   : > { %992 = vpow2.f32 %v483_v58  ;;  %v481_v61 = vsub.f32 %v463_v54, %v476_v59  ;;  %v480_v62 = vsub.f32 %v458_v53, %v474_v60 }
 0x25d   : > { %v487_v63 = vmul.f32 1.442695, %v481_v61  ;;  %v485_v0 = vmul.f32 1.442695, %v480_v62 }
 0x25e   : > { %v478_v1 = vpop.xlane.xlu1 %477 }
 0x25f   : > { %994 = vpow2.f32 %v487_v63  ;;  %v482_v2 = vsub.f32 %v468_v55, %v478_v1 }
 0x260   : > { %996 = vpow2.f32 %v485_v0 }
 0x261   : > { %v489_v3 = vmul.f32 1.442695, %v482_v2 }
 0x263   : > { %998 = vpow2.f32 %v489_v3 }
 0x265   : > { %v993_v4 = vpop.eup %992 }
 0x266   : > { %491 = vadd.xlane.f32.xlu0 %v993_v4 }
 0x269   : > { %v995_v5 = vpop.eup %994 }
 0x26a   : > { %v997_v6 = vpop.eup %996  ;;  %495 = vadd.xlane.f32.xlu0 %v995_v5 }
 0x26b   : > { %493 = vadd.xlane.f32.xlu1 %v997_v6 }
 0x26d   : > { %v999_v7 = vpop.eup %998 }
 0x26f   : > { %497 = vadd.xlane.f32.xlu1 %v999_v7 }
 0x2f3   : > { %v492_v8 = vpop.xlane.xlu0 %491 }
 0x2f4   : > { %1000 = vrcp.f32 %v492_v8 }
 0x2f7   : > { %v496_v9 = vpop.xlane.xlu0 %495 }
 0x2f8   : > { %v494_v10 = vpop.xlane.xlu1 %493  ;;  %1002 = vrcp.f32 %v496_v9 }
 0x2f9   : > { %1004 = vrcp.f32 %v494_v10 }
 0x2fc   : > { %v498_v11 = vpop.xlane.xlu1 %497 }
 0x2fd   : > { %1006 = vrcp.f32 %v498_v11 }
 0x2fe   : > { %v1001_v12 = vpop.eup %1000 }
 0x2ff   : > { %v503_v13 = vmul.f32 %v1001_v12, %v492_v8 }
 0x301   : > { %v507_v14 = vsub.f32 2.0, %v503_v13 }
 0x302   : > { %v1003_v15 = vpop.eup %1002 }
 0x303   : > { %v1005_v16 = vpop.eup %1004  ;;  %v511_v17 = vmul.f32 %v1001_v12, %v507_v14  ;;  %v505_v18 = vmul.f32 %v1003_v15, %v496_v9 }
 0x304   : > { %v504_v19 = vmul.f32 %v1005_v16, %v494_v10 }
 0x305   : > { %v515_v20 = vmul.f32 %v993_v4, %v511_v17  ;;  %v509_v21 = vsub.f32 2.0, %v505_v18 }
 0x306   : > { %v508_v22 = vsub.f32 2.0, %v504_v19 }
 0x307   : > { %v1007_v23 = vpop.eup %1006  ;;  %520 = vst.msk [vmem:[%s1234_s20] sm:$0xff] %vm519_vm1, %v515_v20  ;;  %v513_v24 = vmul.f32 %v1003_v15, %v509_v21 }
 0x308   : > { %v512_v25 = vmul.f32 %v1005_v16, %v508_v22  ;;  %v506_v26 = vmul.f32 %v1007_v23, %v498_v11 }
 0x309   : > { %v517_v27 = vmul.f32 %v995_v5, %v513_v24 }
 0x30a   : > { %v516_v28 = vmul.f32 %v997_v6, %v512_v25  ;;  %v510_v29 = vsub.f32 2.0, %v506_v26  ;;  %530 = sbr.rel (!%p1151_p4) target bundleno = 834 (0x342), region = 44 }
 0x30b   : > { %522 = vst.msk [vmem:[%s1234_s20 + $0x10] sm:$0xff] %vm519_vm1, %v517_v27 }
 0x30c   : > { %521 = vst.msk [vmem:[%s1234_s20 + $0x8] sm:$0xff] %vm519_vm1, %v516_v28  ;;  %v514_v30 = vmul.f32 %v1007_v23, %v510_v29 }
 0x30e   : > { %v518_v31 = vmul.f32 %v999_v7, %v514_v30 }
 0x310   : > { %523 = vst.msk [vmem:[%s1234_s20 + $0x18] sm:$0xff] %vm519_vm1, %v518_v31 }
 0x311   : > { %s1314_s18 = smov (!%p533_p8, %s532_s18), 4 }
 0x312   : > { %s766_s29 = sshll.u32 %s1314_s18, 7 }
 0x313   : > { %p769_p9 = scmp.eq.s32.totalorder %s766_s29, 0 }
 0x314   : > { %s1257_s30 = sshrl.u32 (!%p769_p9), %s1314_s18, 2 }
 0x315   : > { %541 = sbr.rel (%p769_p9) target bundleno = 834 (0x342), region = 48  ;;  %p770_p10 = scmp.le.s32.totalorder (!%p769_p9), %s1257_s30, 0 }
 0x31c   : > { %707 = sbr.rel (%p770_p10) target bundleno = 813 (0x32d), region = 124  ;;  %s1307_s21 = smov (!%p770_p10), %s1251_s28 }
 0x31d   : > { %s1308_s26 = smov (!%p770_p10), %s1234_s20  ;;  %s1266_s8 = smov (!%p770_p10), 0  }
 0x31e   : > { %s1076_s6 = smov (!%p770_p10), 0  }
 0x323 LB: >> { %v609_v32 = vld [vmem:[%s1070_s26] sm:$0xff]  ;;  %v611_v33 = vld [vmem:[%s1070_s26 + $0x8] sm:$0xff]  ;;  %v613_v34 = vld [vmem:[%s1070_s26 + $0x10] sm:$0xff]  ;;  %s617_s7 = sadd.s32 1, %s1074_s8  ;;  %s603_s6 = sadd.s32 1, %s1078_s6   ;;  %s1078_s6 = sphi %s1076_s6, %s603_s6   ;;  %s1074_s8 = sphi %s1266_s8, %s1309_s8   ;;  %s1070_s26 = sphi %s1308_s26, %s622_s26   ;;  %s1066_s21 = sphi %s1307_s21, %s623_s21  }
 0x324   : >> { %610 = vst [vmem:[%s1066_s21] sm:$0xff] %v609_v32  ;;  %612 = vst [vmem:[%s1066_s21 + $0x8] sm:$0xff] %v611_v33  ;;  %v615_v35 = vld [vmem:[%s1070_s26 + $0x18] sm:$0xff]  ;;  %p618_p11 = scmp.ge.s32.totalorder %s617_s7, %s1257_s30  ;;  %p602_p12 = scmp.ge.s32.totalorder %s603_s6, %s1257_s30 }
 0x325   : >> { %614 = vst [vmem:[%s1066_s21 + $0x10] sm:$0xff] %v613_v34  ;;  %616 = vst [vmem:[%s1066_s21 + $0x18] sm:$0xff] %v615_v35 }
 0x326   : >> { %s1316_s7 = smov (%p618_p11, %s617_s7), 0  ;;  %605 = sbr.rel (!%p602_p12) target bundleno = 803 (0x323), region = 130 }
 0x327   : >> { %s771_s9 = sshll.u32 %s1316_s7, 5  ;;  %s1309_s8 = smov %s1316_s7 }
 0x328   : >> { %s622_s26 = scalar_lea.vmem %s1234_s20, %s771_s9 [#allocation2]   ;;  %s623_s21 = scalar_lea.vmem %s1251_s28, %s771_s9  }
 0x32d PF: > { %s1282_s10 = sand.u32 3, %s1314_s18   ;;  %s782_s11 = sshll.u32 %s1257_s30, 5 }
 0x32e   : > { %s628_s12 = scalar_lea.vmem %s1234_s20, %s782_s11 [#allocation2]   ;;  %s630_s13 = scalar_lea.vmem %s1251_s28, %s782_s11  }
 0x32f   : > { %p776_p13 = scmp.le.s32.totalorder %s1282_s10, 0 }
 0x330   : > { %s1080_s14 = smov (!%p776_p13), %s630_s13   ;;  %s1084_s15 = smov (!%p776_p13), %s628_s12  }
 0x331   : > { %721 = sbr.rel (%p776_p13) target bundleno = 834 (0x342), region = 135  ;;  %s1088_s16 = smov (!%p776_p13), 0  }
 0x332   : > { %s1092_s17 = smov (!%p776_p13), 0  }
 0x338 LB: >> { %v640_v36 = vld [vmem:[%s1086_s15] sm:$0xff]  ;;  %s642_s18 = sadd.s32 1, %s1090_s16  ;;  %s634_s17 = sadd.s32 1, %s1094_s17   ;;  %s1094_s17 = sphi %s1092_s17, %s634_s17   ;;  %s1090_s16 = sphi %s1088_s16, %s1089_s16   ;;  %s1086_s15 = sphi %s1084_s15, %s647_s15   ;;  %s1082_s14 = sphi %s1080_s14, %s648_s14  }
 0x339   : >> { %641 = vst [vmem:[%s1082_s14] sm:$0xff] %v640_v36  ;;  %p643_p0 = scmp.ge.s32.totalorder %s642_s18, %s1282_s10  ;;  %p633_p1 = scmp.ge.s32.totalorder %s634_s17, %s1282_s10 }
 0x33b   : >> { %s1318_s18 = smov (%p643_p0, %s642_s18), 0  ;;  %636 = sbr.rel (!%p633_p1) target bundleno = 824 (0x338), region = 141 }
 0x33c   : >> { %s777_s20 = sshll.u32 %s1318_s18, 3  ;;  %s1089_s16 = smov %s1318_s18  }
 0x33d   : >> { %s647_s15 = scalar_lea.vmem %s628_s12, %s777_s20 [#allocation2]   ;;  %s648_s14 = scalar_lea.vmem %s630_s13, %s777_s20  }
 0x342 PF: > { %p12_p2 = scmp.ge.s32.totalorder %s1141_s22, 4   ;;  %s1310_s18 = smov %s1058_s19 }
 0x343   : > { %s1311_s19 = smov %s1149_s25  ;;  %s1312_s20 = smov %s1141_s22 }
 0x344   :  { %14 = sbr.rel (!%p12_p2) target bundleno = 2 (0x2), region = 152 }

</bundles_post_ra>
